<compile_context>
chip_gen: v7x
topology: tpu7x:2x2x1
jax: 0.10.0
libtpu: 0.0.40
codegen_flags: <defaults>
</compile_context>

<pallas_src>
import functools

import jax
import jax.numpy as jnp
from jax.experimental import pallas as pl
from jax.experimental.pallas import tpu as pltpu


def _mtl_kernel(losses_ref, log_vars_ref, is_reg_ref, out_ref, *, reduction, n):
    # Three (1, n) loads; compute in f32 regardless of input dtype.
    losses = losses_ref[...].astype(jnp.float32)      # (1, n)
    log_vars = log_vars_ref[...].astype(jnp.float32)  # (1, n)
    is_reg = is_reg_ref[...].astype(jnp.float32)      # (1, n)

    # Reference math:
    #   stds      = sqrt(exp(log_vars))
    #   coeffs    = 1 / ((is_reg + 1) * stds**2) == exp(-log_vars) / (is_reg + 1)
    #   log(stds) = 0.5 * log_vars
    coeffs = jnp.exp(-log_vars) / (is_reg + 1.0)
    mtl = coeffs * losses + 0.5 * log_vars             # (1, n)

    if reduction == "none":
        out_ref[...] = mtl.astype(out_ref.dtype)
    else:
        total = jnp.sum(mtl)                           # XLU lane reduce, f32
        if reduction == "mean":
            total = total / jnp.float32(n)
        out_ref[0, 0] = total                          # f32 scalar store to SMEM


def multi_task_loss(losses, log_vars, is_regression, reduction="none"):
    """Pallas TPU implementation of MultiTaskLoss.forward.

    Args:
      losses:        (n_tasks,) per-task losses.
      log_vars:      (n_tasks,) learned log-variances (the nn.Parameter).
      is_regression: (n_tasks,) 0/1 indicator (any value accepted; reference formula used).
      reduction:     'none' | 'sum' | 'mean'.

    Returns:
      (n_tasks,) array for 'none', scalar for 'sum'/'mean'.
    """
    dtype = losses.dtype
    n = losses.shape[0]

    # Present each vector as a (1, n) slab (free reshape, no packing kernel).
    losses_2d = losses.reshape(1, n)
    log_vars_2d = log_vars.astype(dtype).reshape(1, n)
    is_reg_2d = is_regression.astype(dtype).reshape(1, n)

    kernel = functools.partial(_mtl_kernel, reduction=reduction, n=n)

    vmem_spec = pl.BlockSpec(memory_space=pltpu.MemorySpace.VMEM)
    in_specs = [vmem_spec, vmem_spec, vmem_spec]

    if reduction in ("sum", "mean"):
        # f32 scalar in SMEM; cast to the user dtype outside the kernel.
        out_shape = jax.ShapeDtypeStruct((1, 1), jnp.float32)
        out_spec = pl.BlockSpec(memory_space=pltpu.MemorySpace.SMEM)
    else:
        out_shape = jax.ShapeDtypeStruct((1, n), dtype)
        out_spec = vmem_spec

    itemsize = jnp.dtype(dtype).itemsize
    cost = pl.CostEstimate(
        flops=5 * n,                      # exp-neg, div, mul, mul, add (+ reduce)
        transcendentals=n,                # the exp
        bytes_accessed=3 * n * itemsize + (n * itemsize if reduction == "none" else 4),
    )

    out = pl.pallas_call(
        kernel,
        out_shape=out_shape,
        in_specs=in_specs,
        out_specs=out_spec,
        cost_estimate=cost,
    )(losses_2d, log_vars_2d, is_reg_2d)

    if reduction in ("sum", "mean"):
        return out[0, 0].astype(dtype)
    return out.reshape(n)


def multi_task_loss_ref(losses, log_vars, is_regression, reduction="none"):
    """Pure-JAX reference matching the PyTorch module exactly."""
    dtype = losses.dtype
    stds = (jnp.exp(log_vars) ** 0.5).astype(dtype)
    is_reg = is_regression.astype(dtype)
    coeffs = 1.0 / ((is_reg + 1.0) * stds**2)
    out = coeffs * losses + jnp.log(stds)
    if reduction == "sum":
        return out.sum()
    if reduction == "mean":
        return out.mean()
    return out


if __name__ == "__main__":
    n_tasks = 8
    key = jax.random.PRNGKey(0)
    k_loss, k_lv = jax.random.split(key)

    # is_regression buffer: alternating regression / classification tasks.
    is_regression = jnp.array([1, 0, 1, 0, 1, 0, 1, 0], dtype=jnp.float32)
    # Example per-task losses (positive values).
    losses = jax.random.uniform(
        k_loss, (n_tasks,), dtype=jnp.float32, minval=0.1, maxval=2.0
    )

    # Case 1: module init state (log_vars = zeros), all reductions.
    log_vars0 = jnp.zeros((n_tasks,), dtype=jnp.float32)
    out_none = jax.block_until_ready(
        multi_task_loss(losses, log_vars0, is_regression, reduction="none")
    )
    ref_none = multi_task_loss_ref(losses, log_vars0, is_regression, reduction="none")
    assert jnp.allclose(out_none, ref_none, atol=1e-6, rtol=1e-6)
    for red in ("sum", "mean"):
        out_r = jax.block_until_ready(
            multi_task_loss(losses, log_vars0, is_regression, reduction=red)
        )
        ref_r = multi_task_loss_ref(losses, log_vars0, is_regression, reduction=red)
        assert jnp.allclose(out_r, ref_r, atol=1e-6, rtol=1e-6)

    # Case 2: non-trivial log_vars to exercise the exp / 0.5*log_vars path.
    log_vars1 = jax.random.uniform(
        k_lv, (n_tasks,), dtype=jnp.float32, minval=-1.0, maxval=1.0
    )
    for red in ("none", "sum", "mean"):
        out_r = jax.block_until_ready(
            multi_task_loss(losses, log_vars1, is_regression, reduction=red)
        )
        ref_r = multi_task_loss_ref(losses, log_vars1, is_regression, reduction=red)
        assert jnp.allclose(out_r, ref_r, atol=1e-5, rtol=1e-5)

    # Case 3: non-binary is_regression to confirm the exact 1/(is_reg+1) path.
    is_reg_odd = jnp.array([0.5, 2.0, 1.0, 0.0, 3.0, 1.0, 0.25, 0.0], dtype=jnp.float32)
    out_r = jax.block_until_ready(
        multi_task_loss(losses, log_vars1, is_reg_odd, reduction="none")
    )
    ref_r = multi_task_loss_ref(losses, log_vars1, is_reg_odd, reduction="none")
    assert jnp.allclose(out_r, ref_r, atol=1e-5, rtol=1e-5)

    print("KERNEL_OK")
</pallas_src>

<mosaic_0001>
module attributes {stable_mosaic.version = 11 : i64} {
  func.func @_mtl_kernel(%arg0: memref<1x8xf32, #tpu.memory_space<vmem>>, %arg1: memref<1x8xf32, #tpu.memory_space<vmem>>, %arg2: memref<1x8xf32, #tpu.memory_space<vmem>>, %arg3: memref<1x8xf32, #tpu.memory_space<vmem>>) attributes {dimension_semantics = [], scalar_prefetch = 0 : i64, scratch_operands = 0 : i64, tpu.core_type = #tpu.core_type<tc>} {
    %c0 = arith.constant 0 : index
    %c0_0 = arith.constant 0 : index
    %0 = vector.load %arg0[%c0, %c0_0] : memref<1x8xf32, #tpu.memory_space<vmem>>, vector<1x8xf32>
    %c0_1 = arith.constant 0 : index
    %c0_2 = arith.constant 0 : index
    %1 = vector.load %arg1[%c0_1, %c0_2] : memref<1x8xf32, #tpu.memory_space<vmem>>, vector<1x8xf32>
    %c0_3 = arith.constant 0 : index
    %c0_4 = arith.constant 0 : index
    %2 = vector.load %arg2[%c0_3, %c0_4] : memref<1x8xf32, #tpu.memory_space<vmem>>, vector<1x8xf32>
    %cst = arith.constant 0.000000e+00 : f32
    %3 = vector.broadcast %cst : f32 to vector<1x8xf32>
    %4 = arith.subf %3, %1 : vector<1x8xf32>
    %5 = math.exp %4 : vector<1x8xf32>
    %cst_5 = arith.constant 1.000000e+00 : f32
    %6 = vector.broadcast %cst_5 : f32 to vector<1x8xf32>
    %7 = arith.addf %2, %6 : vector<1x8xf32>
    %8 = arith.divf %5, %7 : vector<1x8xf32>
    %9 = arith.mulf %8, %0 : vector<1x8xf32>
    %cst_6 = arith.constant 5.000000e-01 : f32
    %10 = vector.broadcast %cst_6 : f32 to vector<1x8xf32>
    %11 = arith.mulf %10, %1 : vector<1x8xf32>
    %12 = arith.addf %9, %11 : vector<1x8xf32>
    %c0_7 = arith.constant 0 : index
    %c0_8 = arith.constant 0 : index
    %13 = vector.load %arg3[%c0_7, %c0_8] : memref<1x8xf32, #tpu.memory_space<vmem>>, vector<1x8xf32>
    tpu.vector_store %arg3[%c0_7, %c0_8], %12 {strides = array<i32>} : memref<1x8xf32, #tpu.memory_space<vmem>>, vector<1x8xf32>,
    return
  }
}

</mosaic_0001>

<bundles_post_ra>
// kernel: tpu_custom_call.1
= control target key start
LH: loop header
LB: loop body
LE: loop exit
PB: predicated region body
PF: predicated region fallthrough
CT: control target
= control target key end

     0   :  { %8 = vsyncpa [#allocation3], 0  ;;  %s162_s0 = inlined_call_operand.hbm [shape: f32[1,8], index: 0, kind: input, shape index: {}]   ;;  %s163_s1 = inlined_call_operand.vmem [shape: f32[1,8], index: 1, kind: input, shape index: {}]   ;;  %s164_s2 = inlined_call_operand.vmem [shape: f32[1,8], index: 2, kind: input, shape index: {}]   ;;  %s165_s3 = inlined_call_operand.hbm [shape: f32[1,8], index: 3, kind: output, shape index: {}]  }
   0x1   :  { %9 = vsyncpa [#allocation4], 0  ;;  %s110_s12 = smov [#allocation2]   ;;  %s62_s16 = scalar_lea.hbm %s162_s0, 16 }
   0x2   :  { %s16_s13 = sshll.u32 %s110_s12, 4  ;;  %p63_p0 = scmp.ne.s32.totalorder %s162_s0, %s62_s16  ;;  %s17_s13 = int_to_ptr.vmem [resolvable:$true] %s16_s13 }
   0x3   :  { %p66_p1 = scmp.lt.u32.totalorder %s62_s16, %s162_s0 }
   0x5   :  { %p68_p2 = pnand %p66_p1, %p63_p0 }
   0x7   :  { %71 = shalt.err (!%p68_p2)
}
   0x8   :  { %s72_s21 = scalar_lea.vmem %s17_s13, 16  ;;  %s76_s22 = scalar_lea.vmem %s17_s13, 32 }
   0x9   :  { %p73_p3 = scmp.ne.s32.totalorder %s17_s13, %s72_s21  ;;  %p77_p4 = scmp.lt.s32.totalorder %s17_s13, %s17_s13 }
   0xa   :  { %p78_p5 = scmp.lt.s32.totalorder %s76_s22, %s72_s21 }
   0xc   :  { %p79_p6 = por %p78_p5, %p77_p4 }
   0xe   :  { %p80_p7 = pnand %p79_p6, %p73_p3 }
  0x10   :  { %83 = shalt.err (!%p80_p7)
}
  0x11   :  { %19 = dma.hbm_to_vmem [thread:$0]  %s162_s0, 16, %s17_s13, [#allocation3]  }
  0x12   :  { %106 = dma.done.wait [#allocation3], 16  }
  0x13   :  { %107 = vsyncadd [#allocation3], 4294967280  ;;  %v28_v0 = vld [vmem:[%s163_s1] sm:$0x1]  ;;  %s111_s0 = smov [#allocation5]   ;;  %vm39_vm0 = vcmask 57344  }
  0x14   :  { %v29_v1 = vld [vmem:[%s164_s2] sm:$0x1]  ;;  %v30_v2 = vsub.f32 0.0, %v28_v0  ;;  %v37_v9 = vmul.f32 0.5, %v28_v0  ;;  %s47_s29 = sshll.u32 %s111_s0, 4  ;;  %s48_s29 = int_to_ptr.vmem [resolvable:$true] %s47_s29 }
  0x15   :  { %v33_v3 = vadd.f32 1.0, %v29_v1  ;;  %v27_v7 = vld [vmem:[#allocation2] sm:$0x1]  ;;  %s84_s1 = scalar_lea.vmem %s48_s29, 16  ;;  %s88_s2 = scalar_lea.vmem %s48_s29, 32 }
  0x16   :  { %v31_v4 = vmul.f32 1.442695, %v30_v2  ;;  %p85_p8 = scmp.ne.s32.totalorder %s48_s29, %s84_s1  ;;  %p89_p9 = scmp.lt.s32.totalorder %s48_s29, %s48_s29 }
  0x17   :  { %58 = vrcp.f32 %v33_v3  ;;  %p90_p10 = scmp.lt.s32.totalorder %s88_s2, %s84_s1 }
  0x18   :  { %60 = vpow2.f32 %v31_v4 }
  0x19   :  { %p91_p11 = por %p90_p10, %p89_p9 }
  0x1b   :  { %p92_p12 = pnand %p91_p11, %p85_p8 }
  0x21   :  { %v59_v5 = vpop.eup %58 }
  0x22   :  { %v61_v6 = vpop.eup %60 }
  0x23   :  { %v35_v8 = vmul.f32 %v61_v6, %v59_v5 }
  0x25   :  { %v36_v10 = vmul.f32 %v35_v8, %v27_v7 }
  0x27   :  { %v38_v11 = vadd.f32 %v37_v9, %v36_v10 }
  0x29   :  { %40 = vst.msk [vmem:[#allocation5] sm:$0x1] %vm39_vm0, %v38_v11 }
  0x2a   :  { %95 = shalt.err (!%p92_p12)
}
  0x2b   :  { %s96_s5 = scalar_lea.hbm %s165_s3, 16 }
  0x2c   :  { %p97_p13 = scmp.ne.s32.totalorder %s165_s3, %s96_s5  ;;  %p100_p0 = scmp.lt.u32.totalorder %s96_s5, %s165_s3 }
  0x2e   :  { %p102_p1 = pnand %p100_p0, %p97_p13 }
  0x30   :  { %105 = shalt.err (!%p102_p1)
}
  0x31   :  { %50 = dma.vmem_to_hbm [thread:$0]  %s48_s29, 16, %s165_s3, [#allocation4]  }
  0x32   :  { %108 = dma.done.wait [#allocation4], 16  }
  0x33   :  { %109 = vsyncadd [#allocation4], 4294967280 }
  0x34   :  { %54 = vsyncpa [#allocation3], 1 }
  0x35   :  { %55 = vsyncpa [#allocation4], 1 }

</bundles_post_ra>
